<compile_context>
chip_gen: v5e
topology: v5e:2x2
jax: 0.10.0
libtpu: 0.0.40
codegen_flags: <defaults>
</compile_context>

<pallas_src>
import math
from functools import partial

import jax
import jax.numpy as jnp
from jax import lax
from jax.experimental import pallas as pl
from jax.experimental.pallas import tpu as pltpu

_SQRT_HALF = 1.0 / math.sqrt(2.0)


# ----------------------------------------------------------------------------
# In-kernel helpers (all math in f32; MXU operands in compute dtype).
# ----------------------------------------------------------------------------
def _layer_norm_f32(x, gamma, beta, eps):
    x = x.astype(jnp.float32)
    mean = jnp.mean(x, axis=-1, keepdims=True)
    xc = x - mean
    var = jnp.mean(xc * xc, axis=-1, keepdims=True)
    xn = xc * lax.rsqrt(var + eps)
    return xn * gamma.astype(jnp.float32) + beta.astype(jnp.float32)


def _gelu_f32(h, approximate):
    if approximate:
        # tanh approximation -> EUP slot (use if VALU-bound).
        return jax.nn.gelu(h, approximate=True)
    # Exact erf GELU, matching torch nn.GELU().
    return 0.5 * h * (1.0 + lax.erf(h * _SQRT_HALF))


# ----------------------------------------------------------------------------
# Kernel A: full-H single pass.  Weights have constant index_map -> loaded once.
# ----------------------------------------------------------------------------
def _mlp_kernel_fullh(x_ref, g_ref, b_ref, w1_ref, b1_ref, w2_ref, b2_ref,
                      o_ref, *, eps, approximate_gelu):
    xn = _layer_norm_f32(x_ref[...], g_ref[...], b_ref[...], eps)       # (tm, E) f32
    hpre = jnp.dot(xn.astype(w1_ref.dtype), w1_ref[...],
                   preferred_element_type=jnp.float32)                  # (tm, H)
    hpre = hpre + b1_ref[...].astype(jnp.float32)
    hact = _gelu_f32(hpre, approximate_gelu)
    out = jnp.dot(hact.astype(w2_ref.dtype), w2_ref[...],
                  preferred_element_type=jnp.float32)                   # (tm, E)
    out = out + b2_ref[...].astype(jnp.float32)
    # Dropout: eval mode (identity).
    # TODO(synk): training-mode dropout needs pltpu.prng_seed/prng_random_bits.
    o_ref[...] = out.astype(o_ref.dtype)


# ----------------------------------------------------------------------------
# Kernel B: h-tiled fallback with persistent f32 accumulator.
# ----------------------------------------------------------------------------
def _mlp_kernel_htiled(x_ref, g_ref, b_ref, w1_ref, b1_ref, w2_ref, b2_ref,
                       o_ref, xn_ref, acc_ref, *, eps, approximate_gelu):
    h_idx = pl.program_id(1)

    # --- h==0: LayerNorm once per row tile, cache in matmul dtype; zero acc ---
    @pl.when(h_idx == 0)
    def _():
        xn = _layer_norm_f32(x_ref[...], g_ref[...], b_ref[...], eps)
        xn_ref[...] = xn.astype(xn_ref.dtype)
        acc_ref[...] = jnp.zeros_like(acc_ref)

    # --- Linear(E -> th slab of H), GELU, accumulate Linear(th -> E) ---
    hpre = jnp.dot(xn_ref[...], w1_ref[...],
                   preferred_element_type=jnp.float32)                  # (tm, th)
    hpre = hpre + b1_ref[...].astype(jnp.float32)
    hact = _gelu_f32(hpre, approximate_gelu)
    acc_ref[...] += jnp.dot(hact.astype(w2_ref.dtype), w2_ref[...],
                            preferred_element_type=jnp.float32)         # (tm, E)

    # --- last h: add output bias once, store ---
    @pl.when(h_idx == pl.num_programs(1) - 1)
    def _():
        out = acc_ref[...] + b2_ref[...].astype(jnp.float32)
        # Dropout: eval mode (identity).
        o_ref[...] = out.astype(o_ref.dtype)


# ----------------------------------------------------------------------------
# Tiling / VMEM budgeting.
# ----------------------------------------------------------------------------
def _round_up(x, m):
    return ((x + m - 1) // m) * m


def _vmem_budget():
    try:
        physical = pltpu.get_tpu_info().vmem_capacity_bytes
    except Exception:
        # Conservative fallback: assume the smallest per-TC VMEM (v7x, 64 MiB).
        physical = 64 * 1024 * 1024
    budget = int(physical * 0.75)      # planning budget for tile selection
    limit = int(physical * 0.90)       # scoped VMEM limit handed to Mosaic
    return budget, limit


def _fullh_footprint(tm, E, H, xsz, csz, osz):
    b = 0
    b += 2 * tm * E * xsz              # x blocks (double-buffered)
    b += 2 * E * H * csz               # w1 (conservatively count 2 buffers)
    b += 2 * H * E * csz               # w2
    b += 2 * tm * E * osz              # out blocks
    b += tm * H * (4 + csz)            # f32 pre-activation + cast copy
    b += 3 * tm * E * 4                # LN temporaries + f32 matmul2 result
    b += 4 * (H + 3 * E) * 4           # biases / gamma / beta (overestimate)
    return b


def _htiled_footprint(tm, th, E, H, xsz, csz, osz, wbuf):
    b = 0
    b += 2 * tm * E * xsz              # x blocks
    b += wbuf * E * th * csz           # w1 slabs
    b += wbuf * th * E * csz           # w2 slabs
    b += 2 * tm * E * osz              # out blocks
    b += tm * E * csz                  # cached LayerNorm scratch
    b += tm * E * 4                    # f32 accumulator scratch
    b += tm * th * (4 + csz)           # f32 pre-activation + cast copy
    b += 2 * tm * E * 4                # misc f32 temporaries
    b += 4 * (th + 3 * E) * 4
    return b


def _select_tiling(M, E, H, xsz, csz, osz, budget, force_h_tiling):
    # Row-tile candidates: as large as the problem / budget allows, multiples
    # of 8 (256-aligned preferred for v6e/v7x MXUs), capped at padded M.
    tm_cap = _round_up(M, 8)
    tm_cands = sorted({min(c, tm_cap) for c in (2048, 1024, 512, 256, 128)},
                      reverse=True)
    th_cands = [c for c in (1024, 512, 256, 128) if c <= H and H % c == 0] or [H]

    if not force_h_tiling:
        for tm in tm_cands:
            if _fullh_footprint(tm, E, H, xsz, csz, osz) <= budget:
                return "fullh", tm, H

    for tm in tm_cands:
        for th in th_cands:
            if _htiled_footprint(tm, th, E, H, xsz, csz, osz, wbuf=3) <= budget:
                return "htiled", tm, th
    # Last resort: smallest tiles (still correct; may rely on vmem_limit slack).
    return "htiled", tm_cands[-1], th_cands[-1]


# ----------------------------------------------------------------------------
# Wrapper.
# ----------------------------------------------------------------------------
def mlp_forward(x, gamma, beta, w1, b1, w2, b2, *, eps=1e-5,
                compute_dtype=None, force_h_tiling=False,
                approximate_gelu=False):
    """x: [B, T, E]; weights stored as (in, out) so y = x @ W + b."""
    B, T, E = x.shape
    H = w1.shape[1]
    M = B * T

    if compute_dtype is None:
        # bf16 MXU operands (f32 accumulate) is the fast path when inputs are f32.
        compute_dtype = (w1.dtype if jnp.dtype(w1.dtype).itemsize <= 2
                         else jnp.bfloat16)
    compute_dtype = jnp.dtype(compute_dtype)

    gamma = jnp.reshape(gamma, (1, E))
    beta = jnp.reshape(beta, (1, E))
    b1 = jnp.reshape(b1, (1, H))
    b2 = jnp.reshape(b2, (1, E))
    w1c = w1.astype(compute_dtype)
    w2c = w2.astype(compute_dtype)

    xsz = jnp.dtype(x.dtype).itemsize
    csz = compute_dtype.itemsize
    osz = xsz
    budget, vmem_limit = _vmem_budget()
    mode, tm, th = _select_tiling(M, E, H, xsz, csz, osz, budget, force_h_tiling)

    # Pad flattened rows so the row tile always divides (masked remainder rows
    # are zero -> finite LayerNorm via +eps, and sliced off below).
    M_pad = _round_up(M, tm)
    x2 = x.reshape(M, E)
    if M_pad != M:
        x2 = jnp.pad(x2, ((0, M_pad - M), (0, 0)))

    common = dict(eps=eps, approximate_gelu=approximate_gelu)

    if mode == "fullh":
        kern = partial(_mlp_kernel_fullh, **common)
        grid_spec = pltpu.PrefetchScalarGridSpec(
            num_scalar_prefetch=0,
            grid=(M_pad // tm,),
            in_specs=[
                pl.BlockSpec((tm, E), lambda i: (i, 0)),   # x rows
                pl.BlockSpec((1, E), lambda i: (0, 0)),    # ln gamma
                pl.BlockSpec((1, E), lambda i: (0, 0)),    # ln beta
                pl.BlockSpec((E, H), lambda i: (0, 0)),    # w1 (DMA'd once)
                pl.BlockSpec((1, H), lambda i: (0, 0)),    # b1
                pl.BlockSpec((H, E), lambda i: (0, 0)),    # w2 (DMA'd once)
                pl.BlockSpec((1, E), lambda i: (0, 0)),    # b2
            ],
            out_specs=pl.BlockSpec((tm, E), lambda i: (i, 0)),
        )
        dim_sem = ("parallel",)
    else:
        n_h = H // th
        wspec_kwargs = {}
        if n_h >= 3:
            # Deeper buffering on the streamed weight slabs hides slab DMA.
            wspec_kwargs = dict(pipeline_mode=pl.Buffered(3))
        kern = partial(_mlp_kernel_htiled, **common)
        grid_spec = pltpu.PrefetchScalarGridSpec(
            num_scalar_prefetch=0,
            grid=(M_pad // tm, n_h),
            in_specs=[
                pl.BlockSpec((tm, E), lambda i, h: (i, 0)),               # x rows
                pl.BlockSpec((1, E), lambda i, h: (0, 0)),                # gamma
                pl.BlockSpec((1, E), lambda i, h: (0, 0)),                # beta
                pl.BlockSpec((E, th), lambda i, h: (0, h), **wspec_kwargs),  # w1 slab
                pl.BlockSpec((1, th), lambda i, h: (0, h)),               # b1 slab
                pl.BlockSpec((th, E), lambda i, h: (h, 0), **wspec_kwargs),  # w2 slab
                pl.BlockSpec((1, E), lambda i, h: (0, 0)),                # b2
            ],
            out_specs=pl.BlockSpec((tm, E), lambda i, h: (i, 0)),
            scratch_shapes=[
                pltpu.VMEM((tm, E), compute_dtype),   # cached LayerNorm output
                pltpu.VMEM((tm, E), jnp.float32),     # f32 output accumulator
            ],
        )
        dim_sem = ("parallel", "arbitrary")

    out = pl.pallas_call(
        kern,
        out_shape=jax.ShapeDtypeStruct((M_pad, E), x.dtype),
        grid_spec=grid_spec,
        compiler_params=pltpu.CompilerParams(
            dimension_semantics=dim_sem,
            vmem_limit_bytes=vmem_limit,
        ),
    )(x2, gamma, beta, w1c, b1, w2c, b2)

    if M_pad != M:
        out = out[:M]
    return out.reshape(B, T, E)


# ----------------------------------------------------------------------------
# Pure-JAX reference (matches torch: LN -> Linear -> GELU -> Linear -> Dropout(eval)).
# ----------------------------------------------------------------------------
def mlp_reference(x, gamma, beta, w1, b1, w2, b2, eps=1e-5):
    xf = x.astype(jnp.float32)
    mean = jnp.mean(xf, axis=-1, keepdims=True)
    var = jnp.mean((xf - mean) ** 2, axis=-1, keepdims=True)
    xn = (xf - mean) * lax.rsqrt(var + eps) * gamma[0] + beta[0]
    h = xn @ w1 + b1[0]
    h = 0.5 * h * (1.0 + lax.erf(h / math.sqrt(2.0)))
    return (h @ w2 + b2[0]).astype(x.dtype)


if __name__ == "__main__":
    # Small shapes implied by the module: embed_size=32, hidden=4*32=128.
    B, T, E = 2, 8, 32
    H = 4 * E
    key = jax.random.PRNGKey(0)
    kx, kg, kb, kw1, kb1, kw2, kb2 = jax.random.split(key, 7)

    x = jax.random.normal(kx, (B, T, E), dtype=jnp.float32)
    gamma = jnp.ones((1, E), jnp.float32) + 0.01 * jax.random.normal(kg, (1, E))
    beta = 0.01 * jax.random.normal(kb, (1, E), dtype=jnp.float32)
    # Linear weights stored as (in, out); deterministic scaled-normal init.
    w1 = jax.random.normal(kw1, (E, H), dtype=jnp.float32) / math.sqrt(E)
    b1 = 0.01 * jax.random.normal(kb1, (1, H), dtype=jnp.float32)
    w2 = jax.random.normal(kw2, (H, E), dtype=jnp.float32) / math.sqrt(H)
    b2 = 0.01 * jax.random.normal(kb2, (1, E), dtype=jnp.float32)

    ref = mlp_reference(x, gamma, beta, w1, b1, w2, b2)

    # 1) Default fast path: fused single-pass ("fullh") kernel, bf16 MXU operands.
    out_bf16 = jax.block_until_ready(mlp_forward(x, gamma, beta, w1, b1, w2, b2))
    assert out_bf16.shape == (B, T, E)
    assert jnp.allclose(out_bf16, ref, atol=5e-2, rtol=5e-2)

    # 2) Exact f32 compute path (tight tolerance check of the fused structure).
    out_f32 = jax.block_until_ready(
        mlp_forward(x, gamma, beta, w1, b1, w2, b2, compute_dtype=jnp.float32))
    assert jnp.allclose(out_f32, ref, atol=1e-4, rtol=1e-4)

    # 3) h-tiled fallback path (used automatically when weights exceed the
    #    per-generation VMEM budget); forced here to exercise it.
    out_ht = jax.block_until_ready(
        mlp_forward(x, gamma, beta, w1, b1, w2, b2,
                    compute_dtype=jnp.float32, force_h_tiling=True))
    assert jnp.allclose(out_ht, ref, atol=1e-4, rtol=1e-4)

    print("KERNEL_OK")
</pallas_src>

<mosaic_0001>
module attributes {stable_mosaic.version = 11 : i64} {
  func.func @_mlp_kernel_fullh(%arg0: i32, %arg1: memref<16x32xf32, #tpu.memory_space<vmem>>, %arg2: memref<1x32xf32, #tpu.memory_space<vmem>>, %arg3: memref<1x32xf32, #tpu.memory_space<vmem>>, %arg4: memref<32x128xbf16, #tpu.memory_space<vmem>>, %arg5: memref<1x128xf32, #tpu.memory_space<vmem>>, %arg6: memref<128x32xbf16, #tpu.memory_space<vmem>>, %arg7: memref<1x32xf32, #tpu.memory_space<vmem>>, %arg8: memref<16x32xf32, #tpu.memory_space<vmem>>) attributes {dimension_semantics = [#tpu.dimension_semantics<parallel>], iteration_bounds = array<i64: 1>, scalar_prefetch = 0 : i64, scratch_operands = 0 : i64, tpu.core_type = #tpu.core_type<tc>, window_params = [{transform_indices = @transform_0, window_bounds = array<i64: 16, 32>}, {pipeline_mode = #tpu.pipeline_mode<synchronous>, transform_indices = @transform_1, window_bounds = array<i64: 1, 32>}, {pipeline_mode = #tpu.pipeline_mode<synchronous>, transform_indices = @transform_2, window_bounds = array<i64: 1, 32>}, {pipeline_mode = #tpu.pipeline_mode<synchronous>, transform_indices = @transform_3, window_bounds = array<i64: 32, 128>}, {pipeline_mode = #tpu.pipeline_mode<synchronous>, transform_indices = @transform_4, window_bounds = array<i64: 1, 128>}, {pipeline_mode = #tpu.pipeline_mode<synchronous>, transform_indices = @transform_5, window_bounds = array<i64: 128, 32>}, {pipeline_mode = #tpu.pipeline_mode<synchronous>, transform_indices = @transform_6, window_bounds = array<i64: 1, 32>}, {transform_indices = @transform_7, window_bounds = array<i64: 16, 32>}]} {
    %c0 = arith.constant 0 : index
    %c0_0 = arith.constant 0 : index
    %0 = vector.load %arg1[%c0, %c0_0] : memref<16x32xf32, #tpu.memory_space<vmem>>, vector<16x32xf32>
    %c0_1 = arith.constant 0 : index
    %c0_2 = arith.constant 0 : index
    %1 = vector.load %arg2[%c0_1, %c0_2] : memref<1x32xf32, #tpu.memory_space<vmem>>, vector<1x32xf32>
    %c0_3 = arith.constant 0 : index
    %c0_4 = arith.constant 0 : index
    %2 = vector.load %arg3[%c0_3, %c0_4] : memref<1x32xf32, #tpu.memory_space<vmem>>, vector<1x32xf32>
    %cst = arith.constant dense<0.000000e+00> : vector<16xf32>
    %3 = vector.multi_reduction <add>, %0, %cst [1] : vector<16x32xf32> to vector<16xf32>
    %4 = vector.shape_cast %3 : vector<16xf32> to vector<16x1xf32>
    %cst_5 = arith.constant 3.200000e+01 : f32
    %5 = vector.broadcast %cst_5 : f32 to vector<16x1xf32>
    %6 = arith.divf %4, %5 : vector<16x1xf32>
    %7 = vector.broadcast %6 : vector<16x1xf32> to vector<16x32xf32>
    %8 = arith.subf %0, %7 : vector<16x32xf32>
    %9 = arith.mulf %8, %8 : vector<16x32xf32>
    %cst_6 = arith.constant dense<0.000000e+00> : vector<16xf32>
    %10 = vector.multi_reduction <add>, %9, %cst_6 [1] : vector<16x32xf32> to vector<16xf32>
    %11 = vector.shape_cast %10 : vector<16xf32> to vector<16x1xf32>
    %cst_7 = arith.constant 3.200000e+01 : f32
    %12 = vector.broadcast %cst_7 : f32 to vector<16x1xf32>
    %13 = arith.divf %11, %12 : vector<16x1xf32>
    %cst_8 = arith.constant 9.99999974E-6 : f32
    %14 = vector.broadcast %cst_8 : f32 to vector<16x1xf32>
    %15 = arith.addf %13, %14 : vector<16x1xf32>
    %16 = math.rsqrt %15 : vector<16x1xf32>
    %17 = vector.broadcast %16 : vector<16x1xf32> to vector<16x32xf32>
    %18 = arith.mulf %8, %17 : vector<16x32xf32>
    %19 = vector.broadcast %1 : vector<1x32xf32> to vector<16x32xf32>
    %20 = arith.mulf %18, %19 : vector<16x32xf32>
    %21 = vector.broadcast %2 : vector<1x32xf32> to vector<16x32xf32>
    %22 = arith.addf %20, %21 : vector<16x32xf32>
    %23 = arith.truncf %22 : vector<16x32xf32> to vector<16x32xbf16>
    %c0_9 = arith.constant 0 : index
    %c0_10 = arith.constant 0 : index
    %24 = vector.load %arg4[%c0_9, %c0_10] : memref<32x128xbf16, #tpu.memory_space<vmem>>, vector<32x128xbf16>
    %cst_11 = arith.constant dense<0.000000e+00> : vector<16x128xf32>
    %25 = tpu.matmul %23, %24, %cst_11 {dimension_numbers = #tpu.dot_dimension_numbers<[1], [0], [0], [1], [0, 0, 1, 1], [], []>} : vector<16x32xbf16>, vector<32x128xbf16>, vector<16x128xf32> -> vector<16x128xf32>
    %c0_12 = arith.constant 0 : index
    %c0_13 = arith.constant 0 : index
    %26 = vector.load %arg5[%c0_12, %c0_13] : memref<1x128xf32, #tpu.memory_space<vmem>>, vector<1x128xf32>
    %27 = vector.broadcast %26 : vector<1x128xf32> to vector<16x128xf32>
    %28 = arith.addf %25, %27 : vector<16x128xf32>
    %cst_14 = arith.constant 5.000000e-01 : f32
    %29 = vector.broadcast %cst_14 : f32 to vector<16x128xf32>
    %30 = arith.mulf %29, %28 : vector<16x128xf32>
    %cst_15 = arith.constant 0.707106769 : f32
    %31 = vector.broadcast %cst_15 : f32 to vector<16x128xf32>
    %32 = arith.mulf %28, %31 : vector<16x128xf32>
    %33 = math.erf %32 : vector<16x128xf32>
    %cst_16 = arith.constant 1.000000e+00 : f32
    %34 = vector.broadcast %cst_16 : f32 to vector<16x128xf32>
    %35 = arith.addf %34, %33 : vector<16x128xf32>
    %36 = arith.mulf %30, %35 : vector<16x128xf32>
    %37 = arith.truncf %36 : vector<16x128xf32> to vector<16x128xbf16>
    %c0_17 = arith.constant 0 : index
    %c0_18 = arith.constant 0 : index
    %38 = vector.load %arg6[%c0_17, %c0_18] : memref<128x32xbf16, #tpu.memory_space<vmem>>, vector<128x32xbf16>
    %cst_19 = arith.constant dense<0.000000e+00> : vector<16x32xf32>
    %39 = tpu.matmul %37, %38, %cst_19 {dimension_numbers = #tpu.dot_dimension_numbers<[1], [0], [0], [1], [0, 0, 1, 1], [], []>} : vector<16x128xbf16>, vector<128x32xbf16>, vector<16x32xf32> -> vector<16x32xf32>
    %c0_20 = arith.constant 0 : index
    %c0_21 = arith.constant 0 : index
    %40 = vector.load %arg7[%c0_20, %c0_21] : memref<1x32xf32, #tpu.memory_space<vmem>>, vector<1x32xf32>
    %41 = vector.broadcast %40 : vector<1x32xf32> to vector<16x32xf32>
    %42 = arith.addf %39, %41 : vector<16x32xf32>
    %c0_22 = arith.constant 0 : index
    %c0_23 = arith.constant 0 : index
    %43 = vector.load %arg8[%c0_22, %c0_23] : memref<16x32xf32, #tpu.memory_space<vmem>>, vector<16x32xf32>
    tpu.vector_store %arg8[%c0_22, %c0_23], %42 {strides = array<i32>} : memref<16x32xf32, #tpu.memory_space<vmem>>, vector<16x32xf32>,
    return
  }
  func.func @transform_0(%arg0: i32) -> (i32, i32) {
    %c0_i32 = arith.constant 0 : i32
    %c0_i32_0 = arith.constant 0 : i32
    return %arg0, %c0_i32 : i32, i32
  }
  func.func @transform_1(%arg0: i32) -> (i32, i32) {
    %c0_i32 = arith.constant 0 : i32
    %c0_i32_0 = arith.constant 0 : i32
    %c0_i32_1 = arith.constant 0 : i32
    return %c0_i32, %c0_i32_0 : i32, i32
  }
  func.func @transform_2(%arg0: i32) -> (i32, i32) {
    %c0_i32 = arith.constant 0 : i32
    %c0_i32_0 = arith.constant 0 : i32
    %c0_i32_1 = arith.constant 0 : i32
    return %c0_i32, %c0_i32_0 : i32, i32
  }
  func.func @transform_3(%arg0: i32) -> (i32, i32) {
    %c0_i32 = arith.constant 0 : i32
    %c0_i32_0 = arith.constant 0 : i32
    %c0_i32_1 = arith.constant 0 : i32
    return %c0_i32, %c0_i32_0 : i32, i32
  }
  func.func @transform_4(%arg0: i32) -> (i32, i32) {
    %c0_i32 = arith.constant 0 : i32
    %c0_i32_0 = arith.constant 0 : i32
    %c0_i32_1 = arith.constant 0 : i32
    return %c0_i32, %c0_i32_0 : i32, i32
  }
  func.func @transform_5(%arg0: i32) -> (i32, i32) {
    %c0_i32 = arith.constant 0 : i32
    %c0_i32_0 = arith.constant 0 : i32
    %c0_i32_1 = arith.constant 0 : i32
    return %c0_i32, %c0_i32_0 : i32, i32
  }
  func.func @transform_6(%arg0: i32) -> (i32, i32) {
    %c0_i32 = arith.constant 0 : i32
    %c0_i32_0 = arith.constant 0 : i32
    %c0_i32_1 = arith.constant 0 : i32
    return %c0_i32, %c0_i32_0 : i32, i32
  }
  func.func @transform_7(%arg0: i32) -> (i32, i32) {
    %c0_i32 = arith.constant 0 : i32
    %c0_i32_0 = arith.constant 0 : i32
    return %arg0, %c0_i32 : i32, i32
  }
}

</mosaic_0001>

<bundles_post_ra>
// kernel: tpu_custom_call.1
= control target key start
LH: loop header
LB: loop body
LE: loop exit
PB: predicated region body
PF: predicated region fallthrough
CT: control target
= control target key end

     0   :  { %vm32_vm0 = vcmask 261120   ;;  %s540_s0 = inlined_call_operand.vmem [shape: f32[16,32], index: 0, kind: input, shape index: {}]   ;;  %s541_s1 = inlined_call_operand.vmem [shape: f32[1,32], index: 1, kind: input, shape index: {}]   ;;  %s542_s2 = inlined_call_operand.vmem [shape: f32[1,32], index: 2, kind: input, shape index: {}]   ;;  %s543_s3 = inlined_call_operand.vmem [shape: bf16[32,128], index: 3, kind: input, shape index: {}]   ;;  %s544_s4 = inlined_call_operand.vmem [shape: f32[1,128], index: 4, kind: input, shape index: {}]   ;;  %s545_s5 = inlined_call_operand.vmem [shape: bf16[128,32], index: 5, kind: input, shape index: {}]   ;;  %s546_s6 = inlined_call_operand.vmem [shape: f32[1,32], index: 6, kind: input, shape index: {}]   ;;  %s547_s7 = inlined_call_operand.hbm [shape: f32[16,32], index: 7, kind: output, shape index: {}]  }
   0x1   :  { %v28_v0 = vld [vmem:[%s540_s0] sm:$0xff] }
   0x2   :  { %v33_v1 = vsel %vm32_vm0, %v28_v0, 0.0 }
   0x3   :  { %34 = vadd.xlane.f32.xlu0 %v33_v1 }
   0x4   :  { %12 = vsyncpa [#allocation3], 0  ;;  %v29_v2 = vld [vmem:[%s540_s0 + $0x8] sm:$0xff]  ;;  %v420_v4 = vmov 32.0   ;;  %v366_v23 = vld [vmem:[%s543_s3] sm:$0xff]  ;;  %s421_s27 = smov [#allocation2]  }
   0x5   :  { %v36_v3 = vsel %vm32_vm0, %v29_v2, 0.0  ;;  %384 = vrcp.f32 %v420_v4  ;;  %v367_v21 = vld [vmem:[%s543_s3 + $0x8] sm:$0xff]  ;;  %v380_v42 = vld [vmem:[%s541_s1] ss:$0 sm:$0xff]  ;;  %v375_v53 = vld [vmem:[%s545_s5 + $0x38] sm:$0xff]  ;;  %s309_s0 = sshll.u32 %s421_s27, 4  ;;  %s310_s0 = int_to_ptr.vmem [resolvable:$true] %s309_s0 }
   0x6   :  { %124 = vmatpush.bf16.msra.mxu0 %v367_v21  ;;  %v381_v47 = vld [vmem:[%s542_s2] ss:$0 sm:$0xff]  ;;  %289 = vmatpush.bf16.msra.mxu1 %v375_v53  ;;  %v374_v57 = vld [vmem:[%s545_s5 + $0x30] sm:$0xff]  ;;  %v373_v59 = vld [vmem:[%s545_s5 + $0x28] sm:$0xff]  ;;  %s311_s30 = sshll.u32 %s547_s7, 4  ;;  %s422_s3 = smov 128   ;;  %s312_s30 = int_to_ptr.hbm [resolvable:$true] %s311_s30 }
   0x7   :  { %v382_v52 = vld [vmem:[%s544_s4] ss:$0 sm:$0xff]  ;;  %s423_s8 = smov 8  }
   0xa   :  { %125 = vmatpush.bf16.msra.mxu0 %v366_v23  ;;  %290 = vmatpush.bf16.msra.mxu1 %v374_v57 }
   0xb   :  { %37 = vadd.xlane.f32.xlu0 %v36_v3  ;;  %v385_v5 = vpop.eup %384 }
   0xc   :  { %v40_v6 = vmul.f32 32.0, %v385_v5  ;;  %vm44_vm1 = vweird.f32 %v385_v5 }
   0xe   :  { %v41_v7 = vsub.f32 1.0, %v40_v6  ;;  %291 = vmatpush.bf16.msra.mxu1 %v373_v59  ;;  %v371_v6 = vld [vmem:[%s545_s5 + $0x18] sm:$0xff] }
  0x10   :  { %v42_v8 = vmul.f32 %v385_v5, %v41_v7 }
  0x12   :  { %v43_v9 = vadd.f32 %v385_v5, %v42_v8 }
  0x14   :  { %v45_v10 = vsel %vm44_vm1, %v385_v5, %v43_v9 }
  0x76   :  { %v35_v11 = vpop.xlane.xlu0 %34 }
  0x77   :  { %v46_v12 = vmul.f32 %v45_v10, %v35_v11 }
  0x79   :  { %v48_v13 = vsub.f32 %v28_v0, %v46_v12  ;;  %v372_v0 = vld [vmem:[%s545_s5 + $0x20] sm:$0xff]  ;;  %v370_v12 = vld [vmem:[%s545_s5 + $0x10] sm:$0xff] }
  0x7a   :  { %292 = vmatpush.bf16.msra.mxu1 %v372_v0 }
  0x7b   :  { %v50_v14 = vmul.f32 %v48_v13, %v48_v13 }
  0x7d   :  { %v52_v15 = vsel %vm32_vm0, %v50_v14, 0.0 }
  0x7e   :  { %53 = vadd.xlane.f32.xlu1 %v52_v15  ;;  %v38_v16 = vpop.xlane.xlu0 %37  ;;  %293 = vmatpush.bf16.msra.mxu1 %v371_v6 }
  0x7f   :  { %v47_v17 = vmul.f32 %v45_v10, %v38_v16 }
  0x81   :  { %v49_v18 = vsub.f32 %v29_v2, %v47_v17 }
  0x82   :  { %294 = vmatpush.bf16.msra.mxu1 %v370_v12 }
  0x83   :  { %v51_v19 = vmul.f32 %v49_v18, %v49_v18 }
  0x85   :  { %v55_v20 = vsel %vm32_vm0, %v51_v19, 0.0 }
  0x86   :  { %56 = vadd.xlane.f32.xlu1 %v55_v20  ;;  %v369_v20 = vld [vmem:[%s545_s5 + $0x8] sm:$0xff] }
  0x87   :  { %295 = vmatpush.bf16.msra.mxu1 %v369_v20 }
  0xf1   :  { %v54_v22 = vpop.xlane.xlu1 %53 }
  0xf2   :  { %v58_v24 = vmul.f32 %v54_v22, %v45_v10 }
  0xf4   :  { %v60_v25 = vadd.f32 1e-05, %v58_v24 }
  0xf6   :  { %386 = vrsqrt.f32 %v60_v25  ;;  %vm68_vm3 = vweird.f32 %v60_v25 }
  0xf9   :  { %v57_v26 = vpop.xlane.xlu1 %56 }
  0xfa   :  { %v59_v27 = vmul.f32 %v57_v26, %v45_v10 }
  0xfc   :  { %v387_v28 = vpop.eup %386  ;;  %v61_v29 = vadd.f32 1e-05, %v59_v27  ;;  %v368_v27 = vld [vmem:[%s545_s5] sm:$0xff] }
  0xfd   :  { %v63_v30 = vmul.f32 %v387_v28, %v60_v25  ;;  %vm69_vm2 = vweird.f32 %v387_v28  ;;  %296 = vmatpush.bf16.msra.mxu1 %v368_v27 }
  0xfe   :  { %388 = vrsqrt.f32 %v61_v29  ;;  %vm70_vm4 = vmor %vm68_vm3, %vm69_vm2  ;;  %vm78_vm6 = vweird.f32 %v61_v29 }
  0xff   :  { %v64_v31 = vmul.f32 %v387_v28, %v63_v30 }
 0x101   :  { %v65_v32 = vmul.f32 0.5, %v64_v31 }
 0x103   :  { %v66_v33 = vsub.f32 1.5, %v65_v32 }
 0x104   :  { %v389_v34 = vpop.eup %388 }
 0x105   :  { %v67_v35 = vmul.f32 %v387_v28, %v66_v33  ;;  %v73_v36 = vmul.f32 %v389_v34, %v61_v29  ;;  %vm79_vm5 = vweird.f32 %v389_v34 }
 0x106   :  { %vm80_vm7 = vmor %vm78_vm6, %vm79_vm5 }
 0x107   :  { %v74_v37 = vmul.f32 %v389_v34, %v73_v36  ;;  %v71_v38 = vsel %vm70_vm4, %v387_v28, %v67_v35 }
 0x108   :  { %v82_v41 = vmul.f32 %v71_v38, %v48_v13 }
 0x109   :  { %v75_v39 = vmul.f32 0.5, %v74_v37 }
 0x10a   :  { %v87_v46 = vmul.f32 %v380_v42, %v82_v41 }
 0x10b   :  { %v76_v40 = vsub.f32 1.5, %v75_v39 }
 0x10c   :  { %v92_v49 = vadd.f32 %v381_v47, %v87_v46 }
 0x10d   :  { %v77_v43 = vmul.f32 %v389_v34, %v76_v40 }
 0x10f   :  { %v81_v44 = vsel %vm80_vm7, %v389_v34, %v77_v43 }
 0x110   :  { %v83_v45 = vmul.f32 %v81_v44, %v49_v18 }
 0x112   :  { %v88_v48 = vmul.f32 %v380_v42, %v83_v45 }
 0x114   :  { %v93_v50 = vadd.f32 %v381_v47, %v88_v48 }
 0x116   :  { %v94_v51 = vpack.c.bf16 %v93_v50, %v92_v49 }
 0x118   :  { %331 = vmatmul.msk.bf16.vlgmr.msra.gmra.mxu0 %vm32_vm0, %v94_v51 }
 0x195   :  { %v127_v54 = vpop.f32.mrf.mxu0 }
 0x196   :  { %v493_v55 = vadd.f32 %v382_v52, %v127_v54 }
 0x198   :  { %v496_v56 = vmul.f32 0.70710677, %v493_v55 }
 0x19a   :  { %v136_v58 = vmul.f32 %v496_v56, %v496_v56 }
 0x19c   :  { %v137_v60 = vmin.f32 %v136_v58, 16.0 }
 0x19d   :  { %v129_v61 = vpop.f32.mrf.mxu0 }
 0x19e   :  { %v138_v62 = vmul.f32 2.1237322e-06, %v137_v60  ;;  %v506_v63 = vadd.f32 %v382_v52, %v129_v61  ;;  %v149_v1 = vmul.f32 3.8918573e-05, %v137_v60 }
 0x1a0   :  { %v139_v2 = vadd.f32 0.00028619796, %v138_v62  ;;  %v512_v3 = vmul.f32 0.70710677, %v506_v63  ;;  %v150_v4 = vadd.f32 0.001143296, %v149_v1 }
 0x1a2   :  { %v176_v5 = vmul.f32 %v512_v3, %v512_v3  ;;  %v140_v7 = vmul.f32 %v139_v2, %v137_v60  ;;  %v151_v8 = vmul.f32 %v150_v4, %v137_v60 }
 0x1a4   :  { %v177_v9 = vmin.f32 %v176_v5, 16.0  ;;  %v152_v10 = vadd.f32 0.014752088, %v151_v8  ;;  %v141_v14 = vadd.f32 0.0036580483, %v140_v7 }
 0x1a6   :  { %v178_v11 = vmul.f32 2.1237322e-06, %v177_v9  ;;  %v189_v13 = vmul.f32 3.8918573e-05, %v177_v9  ;;  %v153_v15 = vmul.f32 %v152_v10, %v137_v60  ;;  %v142_v22 = vmul.f32 %v141_v14, %v137_v60 }
 0x1a7   :  { %v133_v14 = vmul.f32 0.5, %v506_v63 }
 0x1a8   :  { %v179_v16 = vadd.f32 0.00028619796, %v178_v11  ;;  %v190_v17 = vadd.f32 0.001143296, %v189_v13  ;;  %v154_v18 = vadd.f32 0.112945676, %v153_v15 }
 0x1a9   :  { %v143_v29 = vadd.f32 0.05243302, %v142_v22  ;;  %v132_v13 = vmul.f32 0.5, %v493_v55 }
 0x1aa   :  { %v180_v19 = vmul.f32 %v179_v16, %v177_v9  ;;  %v191_v21 = vmul.f32 %v190_v17, %v177_v9  ;;  %v155_v23 = vmul.f32 %v154_v18, %v137_v60 }
 0x1ab   :  { %v144_v35 = vmul.f32 %v143_v29, %v137_v60 }
 0x1ac   :  { %v181_v24 = vadd.f32 0.0036580483, %v180_v19  ;;  %v192_v25 = vadd.f32 0.014752088, %v191_v21  ;;  %v156_v26 = vadd.f32 0.4994258, %v155_v23 }
 0x1ad   :  { %v145_v39 = vadd.f32 0.18741608, %v144_v35 }
 0x1ae   :  { %v193_v28 = vmul.f32 %v192_v25, %v177_v9  ;;  %v157_v30 = vmul.f32 %v156_v26, %v137_v60  ;;  %v182_v31 = vmul.f32 %v181_v24, %v177_v9 }
 0x1af   :  { %v146_v44 = vmul.f32 %v145_v39, %v137_v60 }
 0x1b0   :  { %v194_v32 = vadd.f32 0.112945676, %v193_v28  ;;  %v158_v33 = vadd.f32 1.0, %v157_v30  ;;  %v183_v36 = vadd.f32 0.05243302, %v182_v31 }
 0x1b1   :  { %v147_v50 = vadd.f32 1.1283791, %v146_v44 }
 0x1b2   :  { %v195_v34 = vmul.f32 %v194_v32, %v177_v9  ;;  %390 = vrcp.f32 %v158_v33  ;;  %v184_v40 = vmul.f32 %v183_v36, %v177_v9  ;;  %v170_v47 = vand.u32 2147483648, %v158_v33 }
 0x1b3   :  { %v168_v49 = vand.u32 2147483647, %v158_v33  ;;  %vm164_vm9 = vweird.f32 %v158_v33  ;;  %v148_v59 = vmul.f32 %v147_v50, %v496_v56 }
 0x1b4   :  { %v196_v37 = vadd.f32 0.4994258, %v195_v34  ;;  %v185_v45 = vadd.f32 0.18741608, %v184_v40  ;;  %v171_v54 = vor.u32 1.1754944e-38, %v170_v47 }
 0x1b5   :  { %vm169_vm11 = vcmp.eq.f32.partialorder %v168_v49, 8.507059e+37 }
 0x1b6   :  { %v197_v38 = vmul.f32 %v196_v37, %v177_v9  ;;  %v186_v52 = vmul.f32 %v185_v45, %v177_v9 }
 0x1b8   :  { %v198_v41 = vadd.f32 1.0, %v197_v38  ;;  %v391_v42 = vpop.eup %390  ;;  %v187_v62 = vadd.f32 1.1283791, %v186_v52 }
 0x1b9   :  { %v160_v43 = vmul.f32 %v391_v42, %v158_v33  ;;  %vm165_vm8 = vweird.f32 %v391_v42 }
 0x1ba   :  { %392 = vrcp.f32 %v198_v41  ;;  %vm166_vm10 = vmor %vm164_vm9, %vm165_vm8  ;;  %v210_v0 = vand.u32 2147483648, %v198_v41  ;;  %v208_v4 = vand.u32 2147483647, %v198_v41  ;;  %vm204_vm13 = vweird.f32 %v198_v41 }
 0x1bb   :  { %v161_v46 = vsub.f32 1.0, %v160_v43  ;;  %v188_v7 = vmul.f32 %v187_v62, %v512_v3  ;;  %v383_v3 = vld [vmem:[%s546_s6] ss:$0 sm:$0xff] }
 0x1bc   :  { %v211_v6 = vor.u32 1.1754944e-38, %v210_v0  ;;  %vm209_vm15 = vcmp.eq.f32.partialorder %v208_v4, 8.507059e+37 }
 0x1bd   :  { %v162_v48 = vmul.f32 %v391_v42, %v161_v46 }
 0x1bf   :  { %v163_v53 = vadd.f32 %v391_v42, %v162_v48 }
 0x1c0   :  { %v393_v51 = vpop.eup %392 }
 0x1c1   :  { %v200_v57 = vmul.f32 %v393_v51, %v198_v41  ;;  %v167_v58 = vsel %vm166_vm10, %v391_v42, %v163_v53  ;;  %vm205_vm12 = vweird.f32 %v393_v51 }
 0x1c2   :  { %v172_v61 = vsel %vm169_vm11, %v171_v54, %v167_v58  ;;  %vm206_vm14 = vmor %vm204_vm13, %vm205_vm12 }
 0x1c3   :  { %v201_v60 = vsub.f32 1.0, %v200_v57  ;;  %v173_v1 = vmul.f32 %v172_v61, %v148_v59 }
 0x1c5   :  { %v202_v2 = vmul.f32 %v393_v51, %v201_v60  ;;  %v332_v8 = vclamps-f32 %v173_v1, 1.0 }
 0x1c7   :  { %v203_v5 = vadd.f32 %v393_v51, %v202_v2  ;;  %v216_v12 = vadd.f32 1.0, %v332_v8 }
 0x1c9   :  { %v207_v9 = vsel %vm206_vm14, %v393_v51, %v203_v5  ;;  %v218_v16 = vmul.f32 %v216_v12, %v132_v13 }
 0x1ca   :  { %v212_v10 = vsel %vm209_vm15, %v211_v6, %v207_v9 }
 0x1cb   :  { %v213_v11 = vmul.f32 %v212_v10, %v188_v7 }
 0x1cd   :  { %v333_v56 = vclamps-f32 %v213_v11, 1.0 }
 0x1cf   :  { %v217_v15 = vadd.f32 1.0, %v333_v56 }
 0x1d1   :  { %v219_v17 = vmul.f32 %v217_v15, %v133_v14 }
 0x1d3   :  { %v220_v18 = vpack.c.bf16 %v219_v17, %v218_v16 }
 0x1d5   :  { %297 = vmatmul.bf16.vlgmr.msra.gmra.mxu1 %v220_v18 }
 0x252   :  { %v298_v19 = vpop.f32.mrf.mxu1 }
 0x253   :  { %v299_v20 = vadd.f32 %v383_v3, %v298_v19 }
 0x255   :  { %303 = vst.msk [vmem:[#allocation2] sm:$0xff] %vm32_vm0, %v299_v20 }
 0x25a   :  { %v300_v55 = vpop.f32.mrf.mxu1 }
 0x25b   :  { %v301_v63 = vadd.f32 %v383_v3, %v300_v55 }
 0x25d   :  { %304 = vst.msk [vmem:[#allocation2 + $0x8] sm:$0xff] %vm32_vm0, %v301_v63 }
 0x25e   :  { %317 = dma.vmem_to_hbm [thread:$0]  %s310_s0, 256, %s312_s30, [#allocation3], %s422_s3, %s422_s3, %s423_s8  }
 0x25f   :  { %418 = dma.done.wait [#allocation3], 256  }
 0x260   :  { %419 = vsyncadd [#allocation3], 4294967040 }
 0x261   :  { %322 = vsyncpa [#allocation3], 1 }

</bundles_post_ra>
